<compile_context>
chip_gen: v6e
topology: v6e:2x2x1
jax: 0.10.0
libtpu: 0.0.40
codegen_flags: <defaults>
</compile_context>

<pallas_src>
import jax
import jax.numpy as jnp
from jax.experimental import pallas as pl
from jax.experimental.pallas import tpu as pltpu


def _round_up(x, m):
    return (x + m - 1) // m * m


TILE_N_MAX = 512   # review: 128-row tiles are overhead-dominated; use up to 512
B_ALIGN = 16       # review: bf16 packs 16 rows per sublane group


# ----------------------------------------------------------------------------
# Fused kernel: (both modalities) MLP -> in-kernel nearest-centroid argmin ->
# bilinear score, one grid step per entity-row tile.
# ----------------------------------------------------------------------------
def fused_rep_score_kernel(xt_ref, xi_ref, w1_ref, b1_ref, w2_ref, b2_ref,
                           cent_ref, c2_ref, rel_ref,
                           feat_ref, clus_ref, score_ref):
    k = cent_ref.shape[1]
    feats = []
    clus_rows = []

    # static 2-iteration loop over modalities (text, image)
    for m, x_ref in enumerate((xt_ref, xi_ref)):
        # ---- GetRepresentations MLP: bf16 MXU feeds, f32 accumulate ----
        x = x_ref[...]                                             # (TN, D_in) bf16
        h = jnp.dot(x, w1_ref[...], preferred_element_type=jnp.float32)
        h = jnp.maximum(h + b1_ref[...], 0.0)                      # f32 (VPU)
        feat = jnp.dot(h.astype(jnp.bfloat16), w2_ref[...],
                       preferred_element_type=jnp.float32) + b2_ref[...]
        feat_ref[m] = feat.astype(feat_ref.dtype)
        feats.append(feat)

        # ---- nearest-centroid assignment, fully in-kernel ----
        # argmin_k ||f - c_k||^2 == argmin_k (||c_k||^2 - 2 f.c_k); ||f||^2 dropped.
        # Computed lane-major: dist is (K, TN), so the argmin is a sublane reduce
        # and the resulting cluster-id row is already lane-dense.
        feat_bf = feat.astype(jnp.bfloat16)
        cross = jax.lax.dot_general(cent_ref[m], feat_bf,
                                    (((1,), (1,)), ((), ())),
                                    preferred_element_type=jnp.float32)  # (K, TN)
        dist = c2_ref[m] - 2.0 * cross                                   # (K, TN) f32
        ids = jax.lax.broadcasted_iota(jnp.int32, dist.shape, 0)
        dmin = jnp.min(dist, axis=0, keepdims=True)                      # (1, TN)
        clus_rows.append(jnp.min(jnp.where(dist <= dmin, ids, k),
                                 axis=0, keepdims=True))                 # (1, TN) i32

    clus_ref[...] = jnp.concatenate(clus_rows, axis=0)                   # (2, TN) i32

    # ---- entity scoring: rel [B,D] . (feat_text + feat_img)^T -> [B, TN] ----
    fsum = (feats[0] + feats[1]).astype(jnp.bfloat16)
    score_ref[...] = jax.lax.dot_general(rel_ref[...], fsum,
                                         (((1,), (1,)), ((), ())),
                                         preferred_element_type=jnp.float32)


def fused_rep_score(x_text, x_img, w1, b1, w2, b2,
                    centers_text, centers_img, rel_rep):
    n, d_in = x_text.shape
    h_dim = w1.shape[1]
    d = w2.shape[1]
    k = centers_text.shape[0]
    b = rel_rep.shape[0]

    # Row tiling: largest tile up to TILE_N_MAX, lane dim kept a multiple of 128.
    n_pad128 = _round_up(n, 128)
    tile_n = min(TILE_N_MAX, n_pad128)
    n_pad = _round_up(n, tile_n)
    num_tiles = n_pad // tile_n
    b_pad = _round_up(b, B_ALIGN)

    # pad + bf16 cast (no modality stacking -> no extra HBM copy of x)
    xt = jnp.pad(x_text, ((0, n_pad - n), (0, 0))).astype(jnp.bfloat16)
    xi = jnp.pad(x_img, ((0, n_pad - n), (0, 0))).astype(jnp.bfloat16)
    rel_pad = jnp.pad(rel_rep, ((0, b_pad - b), (0, 0))).astype(jnp.bfloat16)

    # centers (2, K, D) and hoisted ||c||^2 (2, K, 1) — no K padding needed now
    cent = jnp.stack([centers_text, centers_img], axis=0)
    c2 = jnp.sum(cent.astype(jnp.float32) ** 2, axis=-1)[..., None]
    cent_bf = cent.astype(jnp.bfloat16)

    w1b = w1.astype(jnp.bfloat16)
    w2b = w2.astype(jnp.bfloat16)
    b1f = b1.astype(jnp.float32).reshape(1, h_dim)
    b2f = b2.astype(jnp.float32).reshape(1, d)

    flops = (2 * 2 * n_pad * (d_in * h_dim + h_dim * d + k * d)
             + 2 * b_pad * n_pad * d)
    bytes_accessed = int(xt.size * 2 + xi.size * 2 + w1b.size * 2 + w2b.size * 2
                         + b1f.size * 4 + b2f.size * 4 + cent_bf.size * 2
                         + c2.size * 4 + rel_pad.size * 2
                         + 2 * n_pad * d * 4 + 2 * n_pad * 4 + b_pad * n_pad * 4)

    # per-step VMEM footprint (double-buffered blocks) + resident operands
    per_step = (2 * tile_n * d_in * 2      # x_text + x_img (bf16)
                + 2 * tile_n * d * 4       # feat (f32)
                + 8 * tile_n * 4           # cluster ids ((2,TN) padded to 8 sublanes)
                + b_pad * tile_n * 4)      # score
    resident = (d_in * h_dim * 2 + h_dim * d * 2 + (h_dim + d) * 4
                + 2 * k * d * 2 + 2 * k * 4 + b_pad * d * 2)
    vmem_limit = int(min(32 << 20, max(8 << 20, 4 * (per_step + resident))))

    grid_spec = pltpu.PrefetchScalarGridSpec(
        num_scalar_prefetch=0,
        grid=(num_tiles,),
        in_specs=[
            pl.BlockSpec((tile_n, d_in), lambda i: (i, 0)),        # x_text
            pl.BlockSpec((tile_n, d_in), lambda i: (i, 0)),        # x_img
            pl.BlockSpec((d_in, h_dim), lambda i: (0, 0)),         # W1 (resident)
            pl.BlockSpec((1, h_dim), lambda i: (0, 0)),            # b1
            pl.BlockSpec((h_dim, d), lambda i: (0, 0)),            # W2
            pl.BlockSpec((1, d), lambda i: (0, 0)),                # b2
            pl.BlockSpec((2, k, d), lambda i: (0, 0, 0)),          # centers (resident)
            pl.BlockSpec((2, k, 1), lambda i: (0, 0, 0)),          # ||c||^2
            pl.BlockSpec((b_pad, d), lambda i: (0, 0)),            # relations
        ],
        out_specs=(
            pl.BlockSpec((2, tile_n, d), lambda i: (0, i, 0)),     # feat
            pl.BlockSpec((2, tile_n), lambda i: (0, i)),           # cluster ids
            pl.BlockSpec((b_pad, tile_n), lambda i: (0, i)),       # score
        ),
    )

    feat, clus, score = pl.pallas_call(
        fused_rep_score_kernel,
        grid_spec=grid_spec,
        out_shape=(
            jax.ShapeDtypeStruct((2, n_pad, d), jnp.float32),
            jax.ShapeDtypeStruct((2, n_pad), jnp.int32),
            jax.ShapeDtypeStruct((b_pad, n_pad), jnp.float32),
        ),
        compiler_params=pltpu.CompilerParams(
            dimension_semantics=("parallel",),
            vmem_limit_bytes=vmem_limit),
        cost_estimate=pl.CostEstimate(
            flops=flops, transcendentals=0, bytes_accessed=bytes_accessed),
    )(xt, xi, w1b, b1f, w2b, b2f, cent_bf, c2, rel_pad)

    return feat[:, :n, :], clus[:, :n], score[:b, :n]


# ----------------------------------------------------------------------------
# IndMKG forward (JAX wrapper)
# ----------------------------------------------------------------------------
@jax.jit
def indmkg_forward(params, x_text, x_img, batch):
    # query relations: batch[:, 0, 2] (as in the reference forward)
    query_rels = batch[:, 0, 2]

    # TODO(synk): relation_model GNN over data.relation_graph is not provided in
    #             the reference source; approximated by an embedding lookup.
    rel_rep = jnp.take(params["rel_emb"], query_rels, axis=0)     # [B, D]

    # TODO(synk): entity_model body not provided; approximated by a
    #             fused-modality bilinear scoring head rel . (text+img)^T.
    feat, clus, score = fused_rep_score(
        x_text, x_img,
        params["w1"], params["b1"], params["w2"], params["b2"],
        params["centers_text"], params["centers_img"], rel_rep)

    aux = (feat[0], clus[0], params["centers_text"],
           feat[1], clus[1], params["centers_img"])
    return score, aux


if __name__ == "__main__":
    # small shapes implied by the module
    N = 16      # number of entities
    D_IN = 32   # entity_model_cfg.input_dim
    H = 32      # MLP hidden (num_mlp_layers=2)
    D = 32      # representation dim
    K = 4       # number of clusters
    R = 8       # number of relation types
    B = 2       # batch size (triples)

    key = jax.random.PRNGKey(0)
    ks = jax.random.split(key, 8)

    params = {
        "w1": jax.random.normal(ks[0], (D_IN, H), jnp.float32) * 0.1,
        "b1": jnp.zeros((1, H), jnp.float32),
        "w2": jax.random.normal(ks[1], (H, D), jnp.float32) * 0.1,
        "b2": jnp.zeros((1, D), jnp.float32),
        "centers_text": jax.random.normal(ks[2], (K, D), jnp.float32),
        "centers_img": jax.random.normal(ks[3], (K, D), jnp.float32),
        "rel_emb": jax.random.normal(ks[4], (R, D), jnp.float32) * 0.1,
    }

    x_text = jax.random.normal(ks[5], (N, D_IN), jnp.float32)
    x_img = jax.random.normal(ks[6], (N, D_IN), jnp.float32)
    # batch of (head, tail, relation) triples with negatives: [B, 4, 3]
    batch = jax.random.randint(ks[7], (B, 4, 3), 0, R, dtype=jnp.int32)

    score, aux = indmkg_forward(params, x_text, x_img, batch)
    jax.block_until_ready((score, aux))

    assert score.shape == (B, N)
    assert aux[0].shape == (N, D)
    assert aux[1].shape == (N,) and aux[1].dtype == jnp.int32
    assert aux[3].shape == (N, D)
    assert aux[4].shape == (N,) and aux[4].dtype == jnp.int32
    assert bool(jnp.all((aux[1] >= 0) & (aux[1] < K)))
    assert bool(jnp.all((aux[4] >= 0) & (aux[4] < K)))
    print("KERNEL_OK")
</pallas_src>

<mosaic_0001>
module attributes {stable_mosaic.version = 11 : i64} {
  func.func @fused_rep_score_kernel(%arg0: i32, %arg1: memref<128x32xbf16, #tpu.memory_space<vmem>>, %arg2: memref<128x32xbf16, #tpu.memory_space<vmem>>, %arg3: memref<32x32xbf16, #tpu.memory_space<vmem>>, %arg4: memref<1x32xf32, #tpu.memory_space<vmem>>, %arg5: memref<32x32xbf16, #tpu.memory_space<vmem>>, %arg6: memref<1x32xf32, #tpu.memory_space<vmem>>, %arg7: memref<2x4x32xbf16, #tpu.memory_space<vmem>>, %arg8: memref<2x4x1xf32, #tpu.memory_space<vmem>>, %arg9: memref<16x32xbf16, #tpu.memory_space<vmem>>, %arg10: memref<2x128x32xf32, #tpu.memory_space<vmem>>, %arg11: memref<2x128xi32, #tpu.memory_space<vmem>>, %arg12: memref<16x128xf32, #tpu.memory_space<vmem>>) attributes {dimension_semantics = [#tpu.dimension_semantics<parallel>], iteration_bounds = array<i64: 1>, scalar_prefetch = 0 : i64, scratch_operands = 0 : i64, tpu.core_type = #tpu.core_type<tc>, window_params = [{transform_indices = @transform_0, window_bounds = array<i64: 128, 32>}, {transform_indices = @transform_1, window_bounds = array<i64: 128, 32>}, {pipeline_mode = #tpu.pipeline_mode<synchronous>, transform_indices = @transform_2, window_bounds = array<i64: 32, 32>}, {pipeline_mode = #tpu.pipeline_mode<synchronous>, transform_indices = @transform_3, window_bounds = array<i64: 1, 32>}, {pipeline_mode = #tpu.pipeline_mode<synchronous>, transform_indices = @transform_4, window_bounds = array<i64: 32, 32>}, {pipeline_mode = #tpu.pipeline_mode<synchronous>, transform_indices = @transform_5, window_bounds = array<i64: 1, 32>}, {pipeline_mode = #tpu.pipeline_mode<synchronous>, transform_indices = @transform_6, window_bounds = array<i64: 2, 4, 32>}, {pipeline_mode = #tpu.pipeline_mode<synchronous>, transform_indices = @transform_7, window_bounds = array<i64: 2, 4, 1>}, {pipeline_mode = #tpu.pipeline_mode<synchronous>, transform_indices = @transform_8, window_bounds = array<i64: 16, 32>}, {transform_indices = @transform_9, window_bounds = array<i64: 2, 128, 32>}, {transform_indices = @transform_10, window_bounds = array<i64: 2, 128>}, {transform_indices = @transform_11, window_bounds = array<i64: 16, 128>}]} {
    %c0 = arith.constant 0 : index
    %c0_0 = arith.constant 0 : index
    %0 = vector.load %arg1[%c0, %c0_0] : memref<128x32xbf16, #tpu.memory_space<vmem>>, vector<128x32xbf16>
    %c0_1 = arith.constant 0 : index
    %c0_2 = arith.constant 0 : index
    %1 = vector.load %arg3[%c0_1, %c0_2] : memref<32x32xbf16, #tpu.memory_space<vmem>>, vector<32x32xbf16>
    %cst = arith.constant dense<0.000000e+00> : vector<128x32xf32>
    %2 = tpu.matmul %0, %1, %cst {dimension_numbers = #tpu.dot_dimension_numbers<[1], [0], [0], [1], [0, 0, 1, 1], [], []>} : vector<128x32xbf16>, vector<32x32xbf16>, vector<128x32xf32> -> vector<128x32xf32>
    %c0_3 = arith.constant 0 : index
    %c0_4 = arith.constant 0 : index
    %3 = vector.load %arg4[%c0_3, %c0_4] : memref<1x32xf32, #tpu.memory_space<vmem>>, vector<1x32xf32>
    %4 = vector.broadcast %3 : vector<1x32xf32> to vector<128x32xf32>
    %5 = arith.addf %2, %4 : vector<128x32xf32>
    %cst_5 = arith.constant 0.000000e+00 : f32
    %6 = vector.broadcast %cst_5 : f32 to vector<128x32xf32>
    %7 = arith.maximumf %5, %6 : vector<128x32xf32>
    %8 = arith.truncf %7 : vector<128x32xf32> to vector<128x32xbf16>
    %c0_6 = arith.constant 0 : index
    %c0_7 = arith.constant 0 : index
    %9 = vector.load %arg5[%c0_6, %c0_7] : memref<32x32xbf16, #tpu.memory_space<vmem>>, vector<32x32xbf16>
    %cst_8 = arith.constant dense<0.000000e+00> : vector<128x32xf32>
    %10 = tpu.matmul %8, %9, %cst_8 {dimension_numbers = #tpu.dot_dimension_numbers<[1], [0], [0], [1], [0, 0, 1, 1], [], []>} : vector<128x32xbf16>, vector<32x32xbf16>, vector<128x32xf32> -> vector<128x32xf32>
    %c0_9 = arith.constant 0 : index
    %c0_10 = arith.constant 0 : index
    %11 = vector.load %arg6[%c0_9, %c0_10] : memref<1x32xf32, #tpu.memory_space<vmem>>, vector<1x32xf32>
    %12 = vector.broadcast %11 : vector<1x32xf32> to vector<128x32xf32>
    %13 = arith.addf %10, %12 : vector<128x32xf32>
    %c0_11 = arith.constant 0 : index
    %c0_12 = arith.constant 0 : index
    %c0_13 = arith.constant 0 : index
    %14 = vector.load %arg10[%c0_11, %c0_12, %c0_13] : memref<2x128x32xf32, #tpu.memory_space<vmem>>, vector<1x128x32xf32>
    %15 = vector.shape_cast %14 : vector<1x128x32xf32> to vector<128x32xf32>
    %16 = vector.shape_cast %13 : vector<128x32xf32> to vector<1x128x32xf32>
    tpu.vector_store %arg10[%c0_11, %c0_12, %c0_13], %16 {strides = array<i32>} : memref<2x128x32xf32, #tpu.memory_space<vmem>>, vector<1x128x32xf32>,
    %17 = arith.truncf %13 : vector<128x32xf32> to vector<128x32xbf16>
    %c0_14 = arith.constant 0 : index
    %c0_15 = arith.constant 0 : index
    %c0_16 = arith.constant 0 : index
    %18 = vector.load %arg7[%c0_14, %c0_15, %c0_16] : memref<2x4x32xbf16, #tpu.memory_space<vmem>>, vector<1x4x32xbf16>
    %19 = vector.shape_cast %18 : vector<1x4x32xbf16> to vector<4x32xbf16>
    %cst_17 = arith.constant dense<0.000000e+00> : vector<4x128xf32>
    %20 = tpu.matmul %19, %17, %cst_17 {dimension_numbers = #tpu.dot_dimension_numbers<[1], [1], [0], [0], [0, 0, 1, 0], [], []>} : vector<4x32xbf16>, vector<128x32xbf16>, vector<4x128xf32> -> vector<4x128xf32>
    %c0_18 = arith.constant 0 : index
    %c0_19 = arith.constant 0 : index
    %c0_20 = arith.constant 0 : index
    %21 = vector.load %arg8[%c0_18, %c0_19, %c0_20] : memref<2x4x1xf32, #tpu.memory_space<vmem>>, vector<1x4x1xf32>
    %22 = vector.shape_cast %21 : vector<1x4x1xf32> to vector<4x1xf32>
    %cst_21 = arith.constant 2.000000e+00 : f32
    %23 = vector.broadcast %cst_21 : f32 to vector<4x128xf32>
    %24 = arith.mulf %23, %20 : vector<4x128xf32>
    %25 = vector.broadcast %22 : vector<4x1xf32> to vector<4x128xf32>
    %26 = arith.subf %25, %24 : vector<4x128xf32>
    %27 = tpu.iota {dimensions = array<i32: 0>} : vector<4x128xi32>
    %cst_22 = arith.constant dense<0x7F800000> : vector<128xf32>
    %28 = vector.multi_reduction <minimumf>, %26, %cst_22 [0] : vector<4x128xf32> to vector<128xf32>
    %29 = vector.shape_cast %28 : vector<128xf32> to vector<1x128xf32>
    %30 = vector.broadcast %29 : vector<1x128xf32> to vector<4x128xf32>
    %31 = arith.cmpf ole, %26, %30 : vector<4x128xf32>
    %c4_i32 = arith.constant 4 : i32
    %32 = vector.broadcast %c4_i32 : i32 to vector<4x128xi32>
    %33 = arith.select %31, %27, %32 : vector<4x128xi1>, vector<4x128xi32>
    %cst_23 = arith.constant dense<2147483647> : vector<128xi32>
    %34 = vector.multi_reduction <minsi>, %33, %cst_23 [0] : vector<4x128xi32> to vector<128xi32>
    %35 = vector.shape_cast %34 : vector<128xi32> to vector<1x128xi32>
    %c0_24 = arith.constant 0 : index
    %c0_25 = arith.constant 0 : index
    %36 = vector.load %arg2[%c0_24, %c0_25] : memref<128x32xbf16, #tpu.memory_space<vmem>>, vector<128x32xbf16>
    %c0_26 = arith.constant 0 : index
    %c0_27 = arith.constant 0 : index
    %37 = vector.load %arg3[%c0_26, %c0_27] : memref<32x32xbf16, #tpu.memory_space<vmem>>, vector<32x32xbf16>
    %cst_28 = arith.constant dense<0.000000e+00> : vector<128x32xf32>
    %38 = tpu.matmul %36, %37, %cst_28 {dimension_numbers = #tpu.dot_dimension_numbers<[1], [0], [0], [1], [0, 0, 1, 1], [], []>} : vector<128x32xbf16>, vector<32x32xbf16>, vector<128x32xf32> -> vector<128x32xf32>
    %c0_29 = arith.constant 0 : index
    %c0_30 = arith.constant 0 : index
    %39 = vector.load %arg4[%c0_29, %c0_30] : memref<1x32xf32, #tpu.memory_space<vmem>>, vector<1x32xf32>
    %40 = vector.broadcast %39 : vector<1x32xf32> to vector<128x32xf32>
    %41 = arith.addf %38, %40 : vector<128x32xf32>
    %cst_31 = arith.constant 0.000000e+00 : f32
    %42 = vector.broadcast %cst_31 : f32 to vector<128x32xf32>
    %43 = arith.maximumf %41, %42 : vector<128x32xf32>
    %44 = arith.truncf %43 : vector<128x32xf32> to vector<128x32xbf16>
    %c0_32 = arith.constant 0 : index
    %c0_33 = arith.constant 0 : index
    %45 = vector.load %arg5[%c0_32, %c0_33] : memref<32x32xbf16, #tpu.memory_space<vmem>>, vector<32x32xbf16>
    %cst_34 = arith.constant dense<0.000000e+00> : vector<128x32xf32>
    %46 = tpu.matmul %44, %45, %cst_34 {dimension_numbers = #tpu.dot_dimension_numbers<[1], [0], [0], [1], [0, 0, 1, 1], [], []>} : vector<128x32xbf16>, vector<32x32xbf16>, vector<128x32xf32> -> vector<128x32xf32>
    %c0_35 = arith.constant 0 : index
    %c0_36 = arith.constant 0 : index
    %47 = vector.load %arg6[%c0_35, %c0_36] : memref<1x32xf32, #tpu.memory_space<vmem>>, vector<1x32xf32>
    %48 = vector.broadcast %47 : vector<1x32xf32> to vector<128x32xf32>
    %49 = arith.addf %46, %48 : vector<128x32xf32>
    %c1 = arith.constant 1 : index
    %c0_37 = arith.constant 0 : index
    %c0_38 = arith.constant 0 : index
    %50 = vector.load %arg10[%c1, %c0_37, %c0_38] : memref<2x128x32xf32, #tpu.memory_space<vmem>>, vector<1x128x32xf32>
    %51 = vector.shape_cast %50 : vector<1x128x32xf32> to vector<128x32xf32>
    %52 = vector.shape_cast %49 : vector<128x32xf32> to vector<1x128x32xf32>
    tpu.vector_store %arg10[%c1, %c0_37, %c0_38], %52 {strides = array<i32>} : memref<2x128x32xf32, #tpu.memory_space<vmem>>, vector<1x128x32xf32>,
    %53 = arith.truncf %49 : vector<128x32xf32> to vector<128x32xbf16>
    %c1_39 = arith.constant 1 : index
    %c0_40 = arith.constant 0 : index
    %c0_41 = arith.constant 0 : index
    %54 = vector.load %arg7[%c1_39, %c0_40, %c0_41] : memref<2x4x32xbf16, #tpu.memory_space<vmem>>, vector<1x4x32xbf16>
    %55 = vector.shape_cast %54 : vector<1x4x32xbf16> to vector<4x32xbf16>
    %cst_42 = arith.constant dense<0.000000e+00> : vector<4x128xf32>
    %56 = tpu.matmul %55, %53, %cst_42 {dimension_numbers = #tpu.dot_dimension_numbers<[1], [1], [0], [0], [0, 0, 1, 0], [], []>} : vector<4x32xbf16>, vector<128x32xbf16>, vector<4x128xf32> -> vector<4x128xf32>
    %c1_43 = arith.constant 1 : index
    %c0_44 = arith.constant 0 : index
    %c0_45 = arith.constant 0 : index
    %57 = vector.load %arg8[%c1_43, %c0_44, %c0_45] : memref<2x4x1xf32, #tpu.memory_space<vmem>>, vector<1x4x1xf32>
    %58 = vector.shape_cast %57 : vector<1x4x1xf32> to vector<4x1xf32>
    %cst_46 = arith.constant 2.000000e+00 : f32
    %59 = vector.broadcast %cst_46 : f32 to vector<4x128xf32>
    %60 = arith.mulf %59, %56 : vector<4x128xf32>
    %61 = vector.broadcast %58 : vector<4x1xf32> to vector<4x128xf32>
    %62 = arith.subf %61, %60 : vector<4x128xf32>
    %63 = tpu.iota {dimensions = array<i32: 0>} : vector<4x128xi32>
    %cst_47 = arith.constant dense<0x7F800000> : vector<128xf32>
    %64 = vector.multi_reduction <minimumf>, %62, %cst_47 [0] : vector<4x128xf32> to vector<128xf32>
    %65 = vector.shape_cast %64 : vector<128xf32> to vector<1x128xf32>
    %66 = vector.broadcast %65 : vector<1x128xf32> to vector<4x128xf32>
    %67 = arith.cmpf ole, %62, %66 : vector<4x128xf32>
    %c4_i32_48 = arith.constant 4 : i32
    %68 = vector.broadcast %c4_i32_48 : i32 to vector<4x128xi32>
    %69 = arith.select %67, %63, %68 : vector<4x128xi1>, vector<4x128xi32>
    %cst_49 = arith.constant dense<2147483647> : vector<128xi32>
    %70 = vector.multi_reduction <minsi>, %69, %cst_49 [0] : vector<4x128xi32> to vector<128xi32>
    %71 = vector.shape_cast %70 : vector<128xi32> to vector<1x128xi32>
    %72 = tpu.concatenate %35, %71 in 0 : vector<1x128xi32>, vector<1x128xi32> -> vector<2x128xi32>
    %c0_50 = arith.constant 0 : index
    %c0_51 = arith.constant 0 : index
    %73 = vector.load %arg11[%c0_50, %c0_51] : memref<2x128xi32, #tpu.memory_space<vmem>>, vector<2x128xi32>
    tpu.vector_store %arg11[%c0_50, %c0_51], %72 {strides = array<i32>} : memref<2x128xi32, #tpu.memory_space<vmem>>, vector<2x128xi32>,
    %74 = arith.addf %13, %49 : vector<128x32xf32>
    %75 = arith.truncf %74 : vector<128x32xf32> to vector<128x32xbf16>
    %c0_52 = arith.constant 0 : index
    %c0_53 = arith.constant 0 : index
    %76 = vector.load %arg9[%c0_52, %c0_53] : memref<16x32xbf16, #tpu.memory_space<vmem>>, vector<16x32xbf16>
    %cst_54 = arith.constant dense<0.000000e+00> : vector<16x128xf32>
    %77 = tpu.matmul %76, %75, %cst_54 {dimension_numbers = #tpu.dot_dimension_numbers<[1], [1], [0], [0], [0, 0, 1, 0], [], []>} : vector<16x32xbf16>, vector<128x32xbf16>, vector<16x128xf32> -> vector<16x128xf32>
    %c0_55 = arith.constant 0 : index
    %c0_56 = arith.constant 0 : index
    %78 = vector.load %arg12[%c0_55, %c0_56] : memref<16x128xf32, #tpu.memory_space<vmem>>, vector<16x128xf32>
    tpu.vector_store %arg12[%c0_55, %c0_56], %77 {strides = array<i32>} : memref<16x128xf32, #tpu.memory_space<vmem>>, vector<16x128xf32>,
    return
  }
  func.func @transform_0(%arg0: i32) -> (i32, i32) {
    %c0_i32 = arith.constant 0 : i32
    %c0_i32_0 = arith.constant 0 : i32
    return %arg0, %c0_i32 : i32, i32
  }
  func.func @transform_1(%arg0: i32) -> (i32, i32) {
    %c0_i32 = arith.constant 0 : i32
    %c0_i32_0 = arith.constant 0 : i32
    return %arg0, %c0_i32 : i32, i32
  }
  func.func @transform_2(%arg0: i32) -> (i32, i32) {
    %c0_i32 = arith.constant 0 : i32
    %c0_i32_0 = arith.constant 0 : i32
    %c0_i32_1 = arith.constant 0 : i32
    return %c0_i32, %c0_i32_0 : i32, i32
  }
  func.func @transform_3(%arg0: i32) -> (i32, i32) {
    %c0_i32 = arith.constant 0 : i32
    %c0_i32_0 = arith.constant 0 : i32
    %c0_i32_1 = arith.constant 0 : i32
    return %c0_i32, %c0_i32_0 : i32, i32
  }
  func.func @transform_4(%arg0: i32) -> (i32, i32) {
    %c0_i32 = arith.constant 0 : i32
    %c0_i32_0 = arith.constant 0 : i32
    %c0_i32_1 = arith.constant 0 : i32
    return %c0_i32, %c0_i32_0 : i32, i32
  }
  func.func @transform_5(%arg0: i32) -> (i32, i32) {
    %c0_i32 = arith.constant 0 : i32
    %c0_i32_0 = arith.constant 0 : i32
    %c0_i32_1 = arith.constant 0 : i32
    return %c0_i32, %c0_i32_0 : i32, i32
  }
  func.func @transform_6(%arg0: i32) -> (i32, i32, i32) {
    %c0_i32 = arith.constant 0 : i32
    %c0_i32_0 = arith.constant 0 : i32
    %c0_i32_1 = arith.constant 0 : i32
    %c0_i32_2 = arith.constant 0 : i32
    return %c0_i32, %c0_i32_0, %c0_i32_1 : i32, i32, i32
  }
  func.func @transform_7(%arg0: i32) -> (i32, i32, i32) {
    %c0_i32 = arith.constant 0 : i32
    %c0_i32_0 = arith.constant 0 : i32
    %c0_i32_1 = arith.constant 0 : i32
    %c0_i32_2 = arith.constant 0 : i32
    return %c0_i32, %c0_i32_0, %c0_i32_1 : i32, i32, i32
  }
  func.func @transform_8(%arg0: i32) -> (i32, i32) {
    %c0_i32 = arith.constant 0 : i32
    %c0_i32_0 = arith.constant 0 : i32
    %c0_i32_1 = arith.constant 0 : i32
    return %c0_i32, %c0_i32_0 : i32, i32
  }
  func.func @transform_9(%arg0: i32) -> (i32, i32, i32) {
    %c0_i32 = arith.constant 0 : i32
    %c0_i32_0 = arith.constant 0 : i32
    %c0_i32_1 = arith.constant 0 : i32
    return %c0_i32, %arg0, %c0_i32_0 : i32, i32, i32
  }
  func.func @transform_10(%arg0: i32) -> (i32, i32) {
    %c0_i32 = arith.constant 0 : i32
    %c0_i32_0 = arith.constant 0 : i32
    return %c0_i32, %arg0 : i32, i32
  }
  func.func @transform_11(%arg0: i32) -> (i32, i32) {
    %c0_i32 = arith.constant 0 : i32
    %c0_i32_0 = arith.constant 0 : i32
    return %c0_i32, %arg0 : i32, i32
  }
}

</mosaic_0001>

<bundles_post_ra>
// kernel: indmkg_forward.1
= control target key start
LH: loop header
LB: loop body
LE: loop exit
PB: predicated region body
PF: predicated region fallthrough
CT: control target
= control target key end

     0   :  { %vm115_vm0 = vcmask 261120   ;;  %vm1452_vm1 = vmmov 0   ;;  %vm507_vm2 = vcmask 1043456   ;;  %vm1017_vm10 = vcmask 1040384   ;;  %s2046_s2 = inlined_call_operand.vmem [shape: bf16[32,32], index: 2, kind: input, shape index: {}]   ;;  %s2047_s0 = inlined_call_operand.vmem [shape: bf16[128,32], index: 0, kind: input, shape index: {}]   ;;  %s2048_s4 = inlined_call_operand.vmem [shape: bf16[32,32], index: 4, kind: input, shape index: {}]   ;;  %s2049_s1 = inlined_call_operand.vmem [shape: bf16[128,32], index: 1, kind: input, shape index: {}]   ;;  %s2050_s3 = inlined_call_operand.vmem [shape: f32[1,32], index: 3, kind: input, shape index: {}]   ;;  %s2051_s5 = inlined_call_operand.vmem [shape: f32[1,32], index: 5, kind: input, shape index: {}]   ;;  %s2052_s9 = inlined_call_operand.vmem [shape: f32[2,128,32], index: 9, kind: output, shape index: {0}]   ;;  %s2053_s6 = inlined_call_operand.vmem [shape: bf16[2,4,32], index: 6, kind: input, shape index: {}]   ;;  %s2054_s7 = inlined_call_operand.vmem [shape: f32[2,4,1], index: 7, kind: input, shape index: {}]   ;;  %s2055_s8 = inlined_call_operand.vmem [shape: bf16[16,32], index: 8, kind: input, shape index: {}]   ;;  %s2056_s11 = inlined_call_operand.vmem [shape: f32[16,128], index: 11, kind: output, shape index: {2}]   ;;  %s2057_s10 = inlined_call_operand.vmem [shape: s32[2,128], index: 10, kind: output, shape index: {1}]  }
   0x1   :  { %v1426_v0 = vld [vmem:[%s2046_s2 + $0x8] sm:$0xff]   ;;  %v1427_v1 = vld [vmem:[%s2046_s2] sm:$0xff]   ;;  %v1430_v4 = vld [vmem:[%s2047_s0 + $0x10] sm:$0xff]  }
   0x2   :  { %1282 = vmatprep.subr.bf16.mxu0 %v1426_v0  ;;  %v1428_v2 = vld [vmem:[%s2047_s0] sm:$0xff]   ;;  %v1429_v3 = vld [vmem:[%s2047_s0 + $0x8] sm:$0xff]   ;;  %v1431_v5 = vld [vmem:[%s2047_s0 + $0x18] sm:$0xff]  }
   0x3   :  { %1283 = vmatpush3.bf16.msra.mxu0 %v1426_v0  ;;  %1286 = vmatprep.mubr.msk.bf16.mxu0 %vm115_vm0, %v1428_v2  ;;  %v1432_v6 = vld [vmem:[%s2047_s0 + $0x20] sm:$0xff]   ;;  %v1433_v7 = vld [vmem:[%s2047_s0 + $0x28] sm:$0xff]   ;;  %v1434_v8 = vld [vmem:[%s2047_s0 + $0x30] sm:$0xff]  }
   0x4   :  { %1284 = vmatprep.subr.bf16.mxu0 %v1427_v1  ;;  %v1435_v9 = vld [vmem:[%s2047_s0 + $0x38] sm:$0xff]   ;;  %v1436_v10 = vld [vmem:[%s2048_s4 + $0x8] sm:$0xff]   ;;  %v1437_v11 = vld [vmem:[%s2048_s4] sm:$0xff]  }
   0x5   :  { %1302 = vmatprep.subr.bf16.mxu1 %v1436_v10  ;;  %v1438_v12 = vld [vmem:[%s2046_s2 + $0x8] sm:$0xff]   ;;  %v1564_v15 = vld [vmem:[%s2050_s3] ss:$0 sm:$0xff] }
   0x6   :  { %1303 = vmatpush3.bf16.msra.mxu1 %v1436_v10  ;;  %v1439_v31 = vld [vmem:[%s2046_s2] sm:$0xff]   ;;  %v1443_v10 = vld [vmem:[%s2049_s1 + $0x18] sm:$0xff]  }
   0x7   :  { %1285 = vmatpush3.bf16.msra.mxu0 %v1427_v1  ;;  %1304 = vmatprep.subr.bf16.mxu1 %v1437_v11 }
   0xa   :  { %1287 = vmatmul.mubr.msk.bf16.vlgmr.msra.gmra.mxu0 %vm115_vm0, %v1429_v3  ;;  %1305 = vmatpush3.bf16.msra.mxu1 %v1437_v11  ;;  %v1444_v11 = vld [vmem:[%s2049_s1 + $0x20] sm:$0xff]  }
   0xb   :  { %1290 = vmatprep.mubr.msk.bf16.mxu0 %vm115_vm0, %v1430_v4  ;;  %1342 = vmatprep.subr.bf16.mxu1 %v1438_v12 }
  0x12   :  { %1291 = vmatmul.mubr.msk.bf16.gmra.mxu0 %vm115_vm0, %v1431_v5 }
  0x13   :  { %1294 = vmatprep.mubr.msk.bf16.mxu0 %vm115_vm0, %v1432_v6  ;;  %v1440_v6 = vld [vmem:[%s2049_s1] sm:$0xff]  }
  0x1a   :  { %1295 = vmatmul.mubr.msk.bf16.gmra.mxu0 %vm115_vm0, %v1433_v7 }
  0x1b   :  { %1298 = vmatprep.mubr.msk.bf16.mxu0 %vm115_vm0, %v1434_v8  ;;  %v1441_v8 = vld [vmem:[%s2049_s1 + $0x8] sm:$0xff]  }
  0x22   :  { %1299 = vmatmul.mubr.msk.bf16.gmra.mxu0 %vm115_vm0, %v1435_v9  ;;  %v1442_v9 = vld [vmem:[%s2049_s1 + $0x10] sm:$0xff]  }
  0xca   :  { %v1288_v13 = vpop.f32.mrf.mxu0 }
  0xcb   :  { %v183_v19 = vadd.f32 %v1288_v13, %v1564_v15  ;;  %v1446_v13 = vld [vmem:[%s2049_s1 + $0x30] sm:$0xff]  }
  0xcc   :  { %v174_v14 = vpop.f32.mrf.mxu0 }
  0xcd   :  { %v175_v17 = vadd.f32 %v1564_v15, %v174_v14  ;;  %v239_v26 = vmax.f32 %v183_v19, 0.0  ;;  %v1447_v14 = vld [vmem:[%s2049_s1 + $0x38] sm:$0xff]   ;;  %v1636_v19 = vld [vmem:[%s2051_s5] ss:$0 sm:$0xff] }
  0xce   :  { %v1289_v16 = vpop.f32.mrf.mxu0 }
  0xcf   :  { %v186_v18 = vadd.f32 %v1289_v16, %v1564_v15  ;;  %v237_v24 = vmax.f32 %v175_v17, 0.0  ;;  %v1448_v16 = vld [vmem:[%s2048_s4 + $0x8] sm:$0xff]   ;;  %v1449_v17 = vld [vmem:[%s2048_s4] sm:$0xff]  }
  0xd0   :  { %v177_v20 = vpop.f32.mrf.mxu0 }
  0xd1   :  { %v178_v21 = vadd.f32 %v1564_v15, %v177_v20  ;;  %v240_v22 = vmax.f32 %v186_v18, 0.0  ;;  %v1451_v18 = vmov 0.0  }
  0xd2   :  { %v1292_v23 = vpop.f32.mrf.mxu0  ;;  %1322 = vmatprep.subr.bf16.mxu0 %v1451_v18  ;;  %1338 = vmatprep.mubr.msk.bf16.mxu0 %vm1452_vm1, %v1451_v18 }
  0xd3   :  { %v238_v25 = vmax.f32 %v178_v21, 0.0  ;;  %v254_v29 = vpack.c.bf16 %v240_v22, %v239_v26  ;;  %v199_v34 = vadd.f32 %v1292_v23, %v1564_v15 }
  0xd4   :  { %v190_v27 = vpop.f32.mrf.mxu0 }
  0xd5   :  { %v253_v28 = vpack.c.bf16 %v238_v25, %v237_v24  ;;  %v191_v32 = vadd.f32 %v1564_v15, %v190_v27  ;;  %v243_v41 = vmax.f32 %v199_v34, 0.0 }
  0xd6   :  { %v1293_v30 = vpop.f32.mrf.mxu0 }
  0xd7   :  { %v202_v33 = vadd.f32 %v1293_v30, %v1564_v15  ;;  %1306 = vmatprep.mubr.msk.bf16.mxu1 %vm115_vm0, %v253_v28  ;;  %v241_v39 = vmax.f32 %v191_v32, 0.0 }
  0xd8   :  { %v193_v35 = vpop.f32.mrf.mxu0  ;;  %1307 = vmatmul.mubr.msk.bf16.vlgmr.msra.gmra.mxu1 %vm115_vm0, %v254_v29 }
  0xd9   :  { %v194_v36 = vadd.f32 %v1564_v15, %v193_v35  ;;  %1343 = vmatpush3.bf16.msra.mxu1 %v1438_v12  ;;  %v244_v37 = vmax.f32 %v202_v33, 0.0  ;;  %v1445_v12 = vld [vmem:[%s2049_s1 + $0x28] sm:$0xff]  }
  0xda   :  { %v1296_v38 = vpop.f32.mrf.mxu0  ;;  %1344 = vmatprep.subr.bf16.mxu1 %v1439_v31 }
  0xdb   :  { %v242_v40 = vmax.f32 %v194_v36, 0.0  ;;  %v256_v44 = vpack.c.bf16 %v244_v37, %v243_v41  ;;  %v215_v48 = vadd.f32 %v1296_v38, %v1564_v15 }
  0xdc   :  { %v206_v42 = vpop.f32.mrf.mxu0 }
  0xdd   :  { %v255_v43 = vpack.c.bf16 %v242_v40, %v241_v39  ;;  %1345 = vmatpush3.bf16.msra.mxu1 %v1439_v31  ;;  %v207_v46 = vadd.f32 %v1564_v15, %v206_v42  ;;  %v247_v55 = vmax.f32 %v215_v48, 0.0 }
  0xde   :  { %v1297_v45 = vpop.f32.mrf.mxu0  ;;  %1362 = vmatprep.subr.bf16.mxu1 %v1448_v16 }
  0xdf   :  { %v218_v47 = vadd.f32 %v1297_v45, %v1564_v15  ;;  %1310 = vmatprep.mubr.msk.bf16.mxu1 %vm115_vm0, %v255_v43  ;;  %v245_v53 = vmax.f32 %v207_v46, 0.0 }
  0xe0   :  { %v209_v49 = vpop.f32.mrf.mxu0  ;;  %1311 = vmatmul.mubr.msk.bf16.gmra.mxu1 %vm115_vm0, %v256_v44 }
  0xe1   :  { %v210_v50 = vadd.f32 %v1564_v15, %v209_v49  ;;  %v248_v51 = vmax.f32 %v218_v47, 0.0 }
  0xe2   :  { %v1300_v52 = vpop.f32.mrf.mxu0 }
  0xe3   :  { %v246_v54 = vmax.f32 %v210_v50, 0.0  ;;  %v258_v58 = vpack.c.bf16 %v248_v51, %v247_v55  ;;  %v231_v62 = vadd.f32 %v1300_v52, %v1564_v15 }
  0xe4   :  { %v222_v56 = vpop.f32.mrf.mxu0 }
  0xe5   :  { %v257_v57 = vpack.c.bf16 %v246_v54, %v245_v53  ;;  %v223_v60 = vadd.f32 %v1564_v15, %v222_v56  ;;  %v251_v4 = vmax.f32 %v231_v62, 0.0 }
  0xe6   :  { %v1301_v59 = vpop.f32.mrf.mxu0 }
  0xe7   :  { %v234_v61 = vadd.f32 %v1301_v59, %v1564_v15  ;;  %1314 = vmatprep.mubr.msk.bf16.mxu1 %vm115_vm0, %v257_v57  ;;  %v249_v2 = vmax.f32 %v223_v60, 0.0 }
  0xe8   :  { %v225_v63 = vpop.f32.mrf.mxu0  ;;  %1315 = vmatmul.mubr.msk.bf16.gmra.mxu1 %vm115_vm0, %v258_v58 }
  0xe9   :  { %v226_v0 = vadd.f32 %v1564_v15, %v225_v63  ;;  %v252_v1 = vmax.f32 %v234_v61, 0.0 }
  0xeb   :  { %v250_v3 = vmax.f32 %v226_v0, 0.0  ;;  %v260_v7 = vpack.c.bf16 %v252_v1, %v251_v4 }
  0xed   :  { %v259_v5 = vpack.c.bf16 %v250_v3, %v249_v2 }
  0xef   :  { %1318 = vmatprep.mubr.msk.bf16.mxu1 %vm115_vm0, %v259_v5 }
  0xf0   :  { %1319 = vmatmul.mubr.msk.bf16.gmra.mxu1 %vm115_vm0, %v260_v7 }
  0xf1   :  { %1346 = vmatprep.mubr.msk.bf16.mxu1 %vm115_vm0, %v1440_v6 }
  0xf8   :  { %1347 = vmatmul.mubr.msk.bf16.vlgmr.msra.gmra.mxu1 %vm115_vm0, %v1441_v8 }
  0xf9   :  { %1350 = vmatprep.mubr.msk.bf16.mxu1 %vm115_vm0, %v1442_v9  ;;  %1363 = vmatpush3.bf16.msra.mxu1 %v1448_v16 }
  0xfa   :  { %1364 = vmatprep.subr.bf16.mxu1 %v1449_v17 }
  0xfd   :  { %1365 = vmatpush3.bf16.msra.mxu1 %v1449_v17 }
  0xfe   :  { %1402 = vmatprep.subr.bf16.mxu1 %v1451_v18 }
 0x100   :  { %1351 = vmatmul.mubr.msk.bf16.gmra.mxu1 %vm115_vm0, %v1443_v10 }
 0x101   :  { %1354 = vmatprep.mubr.msk.bf16.mxu1 %vm115_vm0, %v1444_v11 }
 0x108   :  { %1355 = vmatmul.mubr.msk.bf16.gmra.mxu1 %vm115_vm0, %v1445_v12 }
 0x109   :  { %1358 = vmatprep.mubr.msk.bf16.mxu1 %vm115_vm0, %v1446_v13 }
 0x110   :  { %1359 = vmatmul.mubr.msk.bf16.gmra.mxu1 %vm115_vm0, %v1447_v14 }
 0x198   :  { %v1308_v20 = vpop.f32.mrf.mxu1 }
 0x199   :  { %v1639_v21 = vadd.f32 %v1308_v20, %v1636_v19 }
 0x19a   :  { %v342_v22 = vpop.f32.mrf.mxu1 }
 0x19b   :  { %407 = vst.msk [vmem:[%s2052_s9 + $0x10] sm:$0xff] %vm115_vm0, %v1639_v21  ;;  %v1647_v23 = vadd.f32 %v1636_v19, %v342_v22 }
 0x19c   :  { %v1309_v24 = vpop.f32.mrf.mxu1 }
 0x19d   :  { %405 = vst.msk [vmem:[%s2052_s9] sm:$0xff] %vm115_vm0, %v1647_v23  ;;  %v1655_v25 = vadd.f32 %v1309_v24, %v1636_v19 }
 0x19e   :  { %v345_v26 = vpop.f32.mrf.mxu1 }
 0x19f   :  { %408 = vst.msk [vmem:[%s2052_s9 + $0x18] sm:$0xff] %vm115_vm0, %v1655_v25  ;;  %v1663_v27 = vadd.f32 %v1636_v19, %v345_v26 }
 0x1a0   :  { %v1312_v28 = vpop.f32.mrf.mxu1 }
 0x1a1   :  { %406 = vst.msk [vmem:[%s2052_s9 + $0x8] sm:$0xff] %vm115_vm0, %v1663_v27  ;;  %v1671_v29 = vadd.f32 %v1312_v28, %v1636_v19 }
 0x1a2   :  { %v358_v30 = vpop.f32.mrf.mxu1 }
 0x1a3   :  { %411 = vst.msk [vmem:[%s2052_s9 + $0x30] sm:$0xff] %vm115_vm0, %v1671_v29  ;;  %v1679_v31 = vadd.f32 %v1636_v19, %v358_v30 }
 0x1a4   :  { %v1313_v32 = vpop.f32.mrf.mxu1 }
 0x1a5   :  { %409 = vst.msk [vmem:[%s2052_s9 + $0x20] sm:$0xff] %vm115_vm0, %v1679_v31  ;;  %v1687_v33 = vadd.f32 %v1313_v32, %v1636_v19 }
 0x1a6   :  { %v361_v34 = vpop.f32.mrf.mxu1 }
 0x1a7   :  { %412 = vst.msk [vmem:[%s2052_s9 + $0x38] sm:$0xff] %vm115_vm0, %v1687_v33  ;;  %v1695_v35 = vadd.f32 %v1636_v19, %v361_v34 }
 0x1a8   :  { %v1316_v36 = vpop.f32.mrf.mxu1 }
 0x1a9   :  { %410 = vst.msk [vmem:[%s2052_s9 + $0x28] sm:$0xff] %vm115_vm0, %v1695_v35  ;;  %v1703_v37 = vadd.f32 %v1316_v36, %v1636_v19 }
 0x1aa   :  { %v374_v38 = vpop.f32.mrf.mxu1 }
 0x1ab   :  { %415 = vst.msk [vmem:[%s2052_s9 + $0x50] sm:$0xff] %vm115_vm0, %v1703_v37  ;;  %v1711_v39 = vadd.f32 %v1636_v19, %v374_v38 }
 0x1ac   :  { %v1317_v40 = vpop.f32.mrf.mxu1 }
 0x1ad   :  { %413 = vst.msk [vmem:[%s2052_s9 + $0x40] sm:$0xff] %vm115_vm0, %v1711_v39  ;;  %v1719_v41 = vadd.f32 %v1317_v40, %v1636_v19 }
 0x1ae   :  { %v377_v42 = vpop.f32.mrf.mxu1 }
 0x1af   :  { %416 = vst.msk [vmem:[%s2052_s9 + $0x58] sm:$0xff] %vm115_vm0, %v1719_v41  ;;  %v1727_v43 = vadd.f32 %v1636_v19, %v377_v42  ;;  %v426_v9 = vpack.c.bf16 %v1719_v41, %v1703_v37 }
 0x1b0   :  { %v1320_v44 = vpop.f32.mrf.mxu1 }
 0x1b1   :  { %414 = vst.msk [vmem:[%s2052_s9 + $0x48] sm:$0xff] %vm115_vm0, %v1727_v43  ;;  %v1735_v45 = vadd.f32 %v1320_v44, %v1636_v19  ;;  %v449_v24 = vsel %vm115_vm0, %v426_v9, 0  ;;  %v425_v36 = vpack.c.bf16 %v1727_v43, %v1711_v39  ;;  %v423_v9 = vpack.c.bf16 %v1695_v35, %v1679_v31 }
 0x1b2   :  { %v390_v46 = vpop.f32.mrf.mxu1 }
 0x1b3   :  { %419 = vst.msk [vmem:[%s2052_s9 + $0x70] sm:$0xff] %vm115_vm0, %v1735_v45  ;;  %v1743_v47 = vadd.f32 %v1636_v19, %v390_v46 }
 0x1b4   :  { %v1321_v48 = vpop.f32.mrf.mxu1 }
 0x1b5   :  { %417 = vst.msk [vmem:[%s2052_s9 + $0x60] sm:$0xff] %vm115_vm0, %v1743_v47  ;;  %v1751_v49 = vadd.f32 %v1321_v48, %v1636_v19 }
 0x1b6   :  { %v393_v50 = vpop.f32.mrf.mxu1 }
 0x1b7   :  { %420 = vst.msk [vmem:[%s2052_s9 + $0x78] sm:$0xff] %vm115_vm0, %v1751_v49  ;;  %v428_v51 = vpack.c.bf16 %v1751_v49, %v1735_v45  ;;  %v1761_v52 = vadd.f32 %v1636_v19, %v393_v50 }
 0x1b8   :  { %v1348_v53 = vpop.f32.mrf.mxu1 }
 0x1b9   :  { %418 = vst.msk [vmem:[%s2052_s9 + $0x68] sm:$0xff] %vm115_vm0, %v1761_v52  ;;  %v455_v54 = vsel %vm115_vm0, %v428_v51, 0  ;;  %v427_v57 = vpack.c.bf16 %v1761_v52, %v1743_v47  ;;  %v673_v60 = vadd.f32 %v1348_v53, %v1564_v15 }
 0x1ba   :  { %1323 = vmatpush3.bf16.xpose.msra.mxu0 %v455_v54  ;;  %v664_v55 = vpop.f32.mrf.mxu1  ;;  %v446_v54 = vsel %vm115_vm0, %v425_v36, 0 }
 0x1bb   :  { %1324 = vmatprep.subr.bf16.mxu0 %v1451_v18  ;;  %v665_v58 = vadd.f32 %v1564_v15, %v664_v55  ;;  %v452_v3 = vsel %vm115_vm0, %v427_v57, 0  ;;  %v729_v4 = vmax.f32 %v673_v60, 0.0  ;;  %v424_v60 = vpack.c.bf16 %v1687_v33, %v1671_v29 }
 0x1bc   :  { %v1349_v56 = vpop.f32.mrf.mxu1 }
 0x1bd   :  { %v676_v59 = vadd.f32 %v1349_v56, %v1564_v15  ;;  %v727_v1 = vmax.f32 %v665_v58, 0.0 }
 0x1be   :  { %v667_v61 = vpop.f32.mrf.mxu1 }
 0x1bf   :  { %v668_v62 = vadd.f32 %v1564_v15, %v667_v61  ;;  %v730_v63 = vmax.f32 %v676_v59, 0.0 }
 0x1c0   :  { %v1352_v0 = vpop.f32.mrf.mxu1 }
 0x1c1   :  { %v728_v2 = vmax.f32 %v668_v62, 0.0  ;;  %v744_v7 = vpack.c.bf16 %v730_v63, %v729_v4  ;;  %v689_v12 = vadd.f32 %v1352_v0, %v1564_v15 }
 0x1c2   :  { %1325 = vmatpush3.bf16.xpose.msra.mxu0 %v452_v3  ;;  %v680_v5 = vpop.f32.mrf.mxu1 }
 0x1c3   :  { %v743_v6 = vpack.c.bf16 %v728_v2, %v727_v1  ;;  %1326 = vmatprep.subr.bf16.mxu0 %v1451_v18  ;;  %v681_v10 = vadd.f32 %v1564_v15, %v680_v5  ;;  %v733_v26 = vmax.f32 %v689_v12, 0.0  ;;  %v443_v5 = vsel %vm115_vm0, %v424_v60, 0 }
 0x1c4   :  { %v1353_v8 = vpop.f32.mrf.mxu1  ;;  %v421_v12 = vpack.c.bf16 %v1663_v27, %v1647_v23 }
 0x1c5   :  { %v692_v11 = vadd.f32 %v1353_v8, %v1564_v15  ;;  %1366 = vmatprep.mubr.msk.bf16.mxu1 %vm115_vm0, %v743_v6  ;;  %v731_v20 = vmax.f32 %v681_v10, 0.0  ;;  %v422_v10 = vpack.c.bf16 %v1655_v25, %v1639_v21 }
 0x1c6   :  { %v683_v13 = vpop.f32.mrf.mxu1  ;;  %1367 = vmatmul.mubr.msk.bf16.vlgmr.msra.gmra.mxu1 %vm115_vm0, %v744_v7 }
 0x1c7   :  { %v684_v14 = vadd.f32 %v1564_v15, %v683_v13  ;;  %v734_v16 = vmax.f32 %v692_v11, 0.0  ;;  %v437_v11 = vsel %vm115_vm0, %v422_v10, 0  ;;  %v434_v13 = vsel %vm115_vm0, %v421_v12, 0 }
 0x1c8   :  { %v1356_v17 = vpop.f32.mrf.mxu1 }
 0x1c9   :  { %v732_v22 = vmax.f32 %v684_v14, 0.0  ;;  %v746_v32 = vpack.c.bf16 %v734_v16, %v733_v26  ;;  %v705_v42 = vadd.f32 %v1356_v17, %v1564_v15  ;;  %v429_v14 = vld [vmem:[%s2053_s6] sm:$0x3]  ;;  %v1453_v16 = vmov 0  }
 0x1ca   :  { %1327 = vmatpush3.bf16.xpose.msra.mxu0 %v449_v24  ;;  %v696_v28 = vpop.f32.mrf.mxu1  ;;  %1425 = vset.pattern.permute.xlu0 %v1453_v16  ;;  %v497_v17 = vld [vmem:[%s2054_s7] sm:$0xf] }
 0x1cb   :  { %v745_v30 = vpack.c.bf16 %v732_v22, %v731_v20  ;;  %1328 = vmatprep.subr.bf16.mxu0 %v1451_v18  ;;  %v697_v38 = vadd.f32 %v1564_v15, %v696_v28  ;;  %v737_v55 = vmax.f32 %v705_v42, 0.0  ;;  %501 = vperm.xlu0 %1425, %v497_v17   ;;  %v1212_v20 = vld [vmem:[%s2054_s7 + $0x4] sm:$0xf] }
 0x1cc   :  { %v1357_v34 = vpop.f32.mrf.mxu1 }
 0x1cd   :  { %v708_v40 = vadd.f32 %v1357_v34, %v1564_v15  ;;  %1370 = vmatprep.mubr.msk.bf16.mxu1 %vm115_vm0, %v745_v30  ;;  %v735_v51 = vmax.f32 %v697_v38, 0.0 }
 0x1ce   :  { %v699_v44 = vpop.f32.mrf.mxu1  ;;  %1371 = vmatmul.mubr.msk.bf16.gmra.mxu1 %vm115_vm0, %v746_v32 }
 0x1cf   :  { %v700_v46 = vadd.f32 %v1564_v15, %v699_v44  ;;  %v738_v48 = vmax.f32 %v708_v40, 0.0  ;;  %994 = vperm.xlu0 %1425, %v1212_v20  }
 0x1d0   :  { %v1360_v50 = vpop.f32.mrf.mxu1 }
 0x1d1   :  { %v736_v53 = vmax.f32 %v700_v46, 0.0  ;;  %v748_v58 = vpack.c.bf16 %v738_v48, %v737_v55  ;;  %v721_v63 = vadd.f32 %v1360_v50, %v1564_v15 }
 0x1d2   :  { %1329 = vmatpush3.bf16.xpose.msra.mxu0 %v446_v54  ;;  %v712_v56 = vpop.f32.mrf.mxu1 }
 0x1d3   :  { %v747_v57 = vpack.c.bf16 %v736_v53, %v735_v51  ;;  %1330 = vmatprep.subr.bf16.mxu0 %v1451_v18  ;;  %v713_v61 = vadd.f32 %v1564_v15, %v712_v56  ;;  %v741_v6 = vmax.f32 %v721_v63, 0.0 }
 0x1d4   :  { %v1361_v59 = vpop.f32.mrf.mxu1 }
 0x1d5   :  { %v724_v62 = vadd.f32 %v1361_v59, %v1564_v15  ;;  %1374 = vmatprep.mubr.msk.bf16.mxu1 %vm115_vm0, %v747_v57  ;;  %v739_v3 = vmax.f32 %v713_v61, 0.0 }
 0x1d6   :  { %v715_v0 = vpop.f32.mrf.mxu1  ;;  %1375 = vmatmul.mubr.msk.bf16.gmra.mxu1 %vm115_vm0, %v748_v58 }
 0x1d7   :  { %v716_v1 = vadd.f32 %v1564_v15, %v715_v0  ;;  %v742_v2 = vmax.f32 %v724_v62, 0.0  ;;  %v440_v15 = vsel %vm115_vm0, %v423_v9, 0 }
 0x1d9   :  { %v740_v4 = vmax.f32 %v716_v1, 0.0  ;;  %v750_v8 = vpack.c.bf16 %v742_v2, %v741_v6 }
 0x1da   :  { %1331 = vmatpush3.bf16.xpose.msra.mxu0 %v443_v5 }
 0x1db   :  { %v749_v7 = vpack.c.bf16 %v740_v4, %v739_v3  ;;  %1332 = vmatprep.subr.bf16.mxu0 %v1451_v18 }
 0x1dd   :  { %1378 = vmatprep.mubr.msk.bf16.mxu1 %vm115_vm0, %v749_v7 }
 0x1de   :  { %1379 = vmatmul.mubr.msk.bf16.gmra.mxu1 %vm115_vm0, %v750_v8 }
 0x1df   :  { %1418 = vmatprep.mubr.msk.bf16.mxu1 %vm1452_vm1, %v1451_v18 }
 0x1e2   :  { %1333 = vmatpush3.bf16.xpose.msra.mxu0 %v440_v15 }
 0x1e3   :  { %1334 = vmatprep.subr.bf16.mxu0 %v1451_v18 }
 0x1ea   :  { %1335 = vmatpush3.bf16.xpose.msra.mxu0 %v437_v11 }
 0x1eb   :  { %1336 = vmatprep.subr.bf16.mxu0 %v1451_v18 }
 0x1f2   :  { %1337 = vmatpush3.bf16.xpose.msra.mxu0 %v434_v13 }
 0x1f3   :  { %1382 = vmatprep.subr.bf16.mxu0 %v1451_v18 }
 0x1f9   :  { %1339 = vmatmul.mubr.msk.bf16.vlgmr.msra.gmra.mxu0 %vm115_vm0, %v429_v14 }
 0x1fa   :  { %1398 = vmatprep.mubr.msk.bf16.mxu0 %vm1452_vm1, %v1451_v18 }
 0x286   :  { %v1368_v22 = vpop.f32.mrf.mxu1 }
 0x287   :  { %v1836_v24 = vadd.f32 %v1368_v22, %v1636_v19 }
 0x288   :  { %v832_v26 = vpop.f32.mrf.mxu1 }
 0x289   :  { %1196 = vst.msk [vmem:[%s2052_s9 + $0x90] sm:$0xff] %vm115_vm0, %v1836_v24  ;;  %v1844_v28 = vadd.f32 %v1636_v19, %v832_v26  ;;  %v1870_v42 = vadd.f32 %v1836_v24, %v1639_v21 }
 0x28a   :  { %v1369_v30 = vpop.f32.mrf.mxu1 }
 0x28b   :  { %1194 = vst.msk [vmem:[%s2052_s9 + $0x80] sm:$0xff] %vm115_vm0, %v1844_v28  ;;  %v1852_v32 = vadd.f32 %v1369_v30, %v1636_v19  ;;  %v1874_v46 = vadd.f32 %v1844_v28, %v1647_v23 }
 0x28c   :  { %v835_v34 = vpop.f32.mrf.mxu1 }
 0x28d   :  { %1197 = vst.msk [vmem:[%s2052_s9 + $0x98] sm:$0xff] %vm115_vm0, %v1852_v32  ;;  %v913_v36 = vpack.c.bf16 %v1852_v32, %v1836_v24  ;;  %v1863_v38 = vadd.f32 %v1852_v32, %v1655_v25  ;;  %v1866_v40 = vadd.f32 %v1636_v19, %v835_v34  ;;  %v1210_v32 = vld [vmem:[%s2053_s6 + $0x2] sm:$0x3] }
 0x28e   :  { %v1372_v44 = vpop.f32.mrf.mxu1 }
 0x28f   :  { %1195 = vst.msk [vmem:[%s2052_s9 + $0x88] sm:$0xff] %vm115_vm0, %v1866_v40  ;;  %v912_v25 = vpack.c.bf16 %v1866_v40, %v1844_v28  ;;  %v1885_v48 = vadd.f32 %v1866_v40, %v1663_v27  ;;  %v1888_v21 = vadd.f32 %v1372_v44, %v1636_v19  ;;  %v1037_v23 = vpack.c.bf16 %v1863_v38, %v1870_v42 }
 0x290   :  { %v848_v50 = vpop.f32.mrf.mxu1 }
 0x291   :  { %1200 = vst.msk [vmem:[%s2052_s9 + $0xb0] sm:$0xff] %vm115_vm0, %v1888_v21  ;;  %v1898_v51 = vadd.f32 %v1636_v19, %v848_v50  ;;  %v1036_v27 = vpack.c.bf16 %v1885_v48, %v1874_v46 }
 0x292   :  { %v1373_v53 = vpop.f32.mrf.mxu1 }
 0x293   :  { %1198 = vst.msk [vmem:[%s2052_s9 + $0xa0] sm:$0xff] %vm115_vm0, %v1898_v51  ;;  %v1908_v54 = vadd.f32 %v1373_v53, %v1636_v19  ;;  %v1055_v24 = vsel %vm115_vm0, %v1036_v27, 0  ;;  %v505_v27 = vlaneseq }
 0x294   :  { %v851_v55 = vpop.f32.mrf.mxu1 }
 0x295   :  { %1201 = vst.msk [vmem:[%s2052_s9 + $0xb8] sm:$0xff] %vm115_vm0, %v1908_v54  ;;  %v1916_v56 = vadd.f32 %v1636_v19, %v851_v55  ;;  %v1027_v53 = vadd.f32 %v1908_v54, %v1687_v33 }
 0x296   :  { %v1376_v57 = vpop.f32.mrf.mxu1 }
 0x297   :  { %1199 = vst.msk [vmem:[%s2052_s9 + $0xa8] sm:$0xff] %vm115_vm0, %v1916_v56  ;;  %v873_v58 = vadd.f32 %v1376_v57, %v1636_v19  ;;  %v1025_v33 = vadd.f32 %v1916_v56, %v1695_v35 }
 0x298   :  { %v864_v59 = vpop.f32.mrf.mxu1 }
 0x299   :  { %1204 = vst.msk [vmem:[%s2052_s9 + $0xd0] sm:$0xff] %vm115_vm0, %v873_v58  ;;  %v865_v60 = vadd.f32 %v1636_v19, %v864_v59 }
 0x29a   :  { %v1377_v61 = vpop.f32.mrf.mxu1 }
 0x29b   :  { %1202 = vst.msk [vmem:[%s2052_s9 + $0xc0] sm:$0xff] %vm115_vm0, %v865_v60  ;;  %v876_v62 = vadd.f32 %v1377_v61, %v1636_v19 }
 0x29c   :  { %v867_v63 = vpop.f32.mrf.mxu1 }
 0x29d   :  { %1205 = vst.msk [vmem:[%s2052_s9 + $0xd8] sm:$0xff] %vm115_vm0, %v876_v62  ;;  %v868_v0 = vadd.f32 %v1636_v19, %v867_v63  ;;  %v1031_v17 = vadd.f32 %v876_v62, %v1719_v41  ;;  %v917_v22 = vpack.c.bf16 %v876_v62, %v873_v58  ;;  %v1028_v41 = vadd.f32 %v865_v60, %v1711_v39 }
 0x29e   :  { %v1380_v1 = vpop.f32.mrf.mxu1  ;;  %v915_v39 = vpack.c.bf16 %v1908_v54, %v1888_v21 }
 0x29f   :  { %1203 = vst.msk [vmem:[%s2052_s9 + $0xc8] sm:$0xff] %vm115_vm0, %v868_v0  ;;  %v889_v2 = vadd.f32 %v1380_v1, %v1636_v19  ;;  %v941_v26 = vsel %vm115_vm0, %v917_v22, 0  ;;  %v1029_v30 = vadd.f32 %v868_v0, %v1727_v43  ;;  %v916_v44 = vpack.c.bf16 %v868_v0, %v865_v60 }
 0x2a0   :  { %v880_v3 = vpop.f32.mrf.mxu1  ;;  %v1026_v43 = vadd.f32 %v1888_v21, %v1671_v29  ;;  %v1024_v29 = vadd.f32 %v1898_v51, %v1679_v31  ;;  %v914_v21 = vpack.c.bf16 %v1916_v56, %v1898_v51  ;;  %v929_v31 = vsel %vm115_vm0, %v913_v36, 0  ;;  %v502_v36 = vpop.permute.xlu0 %501 }
 0x2a1   :  { %1208 = vst.msk [vmem:[%s2052_s9 + $0xf0] sm:$0xff] %vm115_vm0, %v889_v2  ;;  %v881_v4 = vadd.f32 %v1636_v19, %v880_v3  ;;  %v1034_v8 = vadd.f32 %v889_v2, %v1735_v45  ;;  %v938_v50 = vsel %vm115_vm0, %v916_v44, 0  ;;  %v1058_v56 = vsel %vm115_vm0, %v1037_v23, 0 }
 0x2a2   :  { %v1381_v5 = vpop.f32.mrf.mxu1  ;;  %v1039_v57 = vpack.c.bf16 %v1027_v53, %v1026_v43  ;;  %v1038_v54 = vpack.c.bf16 %v1025_v33, %v1024_v29  ;;  %v932_v60 = vsel %vm115_vm0, %v914_v21, 0  ;;  %v926_v0 = vsel %vm115_vm0, %v912_v25, 0 }
 0x2a3   :  { %1206 = vst.msk [vmem:[%s2052_s9 + $0xe0] sm:$0xff] %vm115_vm0, %v881_v4  ;;  %v892_v6 = vadd.f32 %v1381_v5, %v1636_v19 }
 0x2a4   :  { %v883_v7 = vpop.f32.mrf.mxu1  ;;  %v1064_v59 = vsel %vm115_vm0, %v1039_v57, 0  ;;  %v1061_v61 = vsel %vm115_vm0, %v1038_v54, 0  ;;  %v995_v5 = vpop.permute.xlu0 %994 }
 0x2a5   :  { %1209 = vst.msk [vmem:[%s2052_s9 + $0xf8] sm:$0xff] %vm115_vm0, %v892_v6  ;;  %v919_v9 = vpack.c.bf16 %v892_v6, %v889_v2  ;;  %v1035_v15 = vadd.f32 %v892_v6, %v1751_v49  ;;  %v884_v10 = vadd.f32 %v1636_v19, %v883_v7  ;;  %v1032_v49 = vadd.f32 %v881_v4, %v1743_v47 }
 0x2a6   :  { %v506_v2 = vshrl.u32 %v505_v27, 7 }
 0x2a7   :  { %1207 = vst.msk [vmem:[%s2052_s9 + $0xe8] sm:$0xff] %vm115_vm0, %v884_v10  ;;  %v947_v11 = vsel %vm115_vm0, %v919_v9, 0  ;;  %v1043_v12 = vpack.c.bf16 %v1035_v15, %v1034_v8  ;;  %v1033_v45 = vadd.f32 %v884_v10, %v1761_v52  ;;  %v918_v14 = vpack.c.bf16 %v884_v10, %v881_v4 }
 0x2a8   :  { %1383 = vmatpush3.bf16.xpose.msra.mxu0 %v947_v11  ;;  %v1030_v52 = vadd.f32 %v873_v58, %v1703_v37  ;;  %v1040_v37 = vpack.c.bf16 %v1029_v30, %v1028_v41  ;;  %v935_v58 = vsel %vm115_vm0, %v915_v39, 0 }
 0x2a9   :  { %v1076_v13 = vsel %vm115_vm0, %v1043_v12, 0  ;;  %1384 = vmatprep.subr.bf16.mxu0 %v1451_v18  ;;  %v1042_v19 = vpack.c.bf16 %v1033_v45, %v1032_v49  ;;  %v944_v16 = vsel %vm115_vm0, %v918_v14, 0 }
 0x2aa   :  { %1403 = vmatpush3.bf16.xpose.msra.mxu1 %v1076_v13  ;;  %v1041_v47 = vpack.c.bf16 %v1031_v17, %v1030_v52  ;;  %v1067_v55 = vsel %vm115_vm0, %v1040_v37, 0 }
 0x2ab   :  { %1404 = vmatprep.subr.bf16.mxu1 %v1451_v18  ;;  %v1073_v20 = vsel %vm115_vm0, %v1042_v19, 0 }
 0x2ac   :  { %v1070_v34 = vsel %vm115_vm0, %v1041_v47, 0 }
 0x2b0   :  { %1385 = vmatpush3.bf16.xpose.msra.mxu0 %v944_v16 }
 0x2b1   :  { %1386 = vmatprep.subr.bf16.mxu0 %v1451_v18 }
 0x2b2   :  { %1405 = vmatpush3.bf16.xpose.msra.mxu1 %v1073_v20 }
 0x2b3   :  { %1406 = vmatprep.subr.bf16.mxu1 %v1451_v18 }
 0x2b8   :  { %1387 = vmatpush3.bf16.xpose.msra.mxu0 %v941_v26 }
 0x2b9   :  { %1388 = vmatprep.subr.bf16.mxu0 %v1451_v18  ;;  %v491_v35 = vpop.f32.mrf.mxu0 }
 0x2ba   :  { %1407 = vmatpush3.bf16.xpose.msra.mxu1 %v1070_v34  ;;  %v498_v28 = vmul.f32 2.0, %v491_v35 }
 0x2bb   :  { %1408 = vmatprep.subr.bf16.mxu1 %v1451_v18  ;;  %v1340_v62 = vpop.f32.mrf.mxu0 }
 0x2bc   :  { %v504_v38 = vsub.f32 %v502_v36, %v498_v28 }
 0x2bd   :  { %v494_v63 = vpop.f32.mrf.mxu0 }
 0x2be   :  { %v508_v40 = vsel %vm507_vm2, %v504_v38, inf }
 0x2bf   :  { %v1341_v51 = vpop.f32.mrf.mxu0  ;;  %v509_v42 = vrot.slane %v508_v40, 4 }
 0x2c0   :  { %1389 = vmatpush3.bf16.xpose.msra.mxu0 %v938_v50 }
 0x2c1   :  { %1390 = vmatprep.subr.bf16.mxu0 %v1451_v18  ;;  %v510_v46 = vmin.f32 %v508_v40, %v509_v42 }
 0x2c2   :  { %1409 = vmatpush3.bf16.xpose.msra.mxu1 %v1067_v55 }
 0x2c3   :  { %1410 = vmatprep.subr.bf16.mxu1 %v1451_v18  ;;  %v511_v25 = vrot.slane %v510_v46, 2 }
 0x2c5   :  { %v512_v48 = vmin.f32 %v510_v46, %v511_v25 }
 0x2c7   :  { %v513_v23 = vrot.slane %v512_v48, 1 }
 0x2c8   :  { %1391 = vmatpush3.bf16.xpose.msra.mxu0 %v935_v58 }
 0x2c9   :  { %1392 = vmatprep.subr.bf16.mxu0 %v1451_v18  ;;  %v514_v1 = vmin.f32 %v512_v48, %v513_v23 }
 0x2ca   :  { %1411 = vmatpush3.bf16.xpose.msra.mxu1 %v1064_v59 }
 0x2cb   :  { %1412 = vmatprep.subr.bf16.mxu1 %v1451_v18  ;;  %vm515_vm3 = vcmp.le.f32.partialorder %v504_v38, %v514_v1 }
 0x2cc   :  { %v516_v3 = vsel %vm515_vm3, %v506_v2, 4 }
 0x2cd   :  { %v517_v7 = vsel %vm507_vm2, %v516_v3, 2147483647 }
 0x2ce   :  { %v518_v12 = vrot.slane %v517_v7, 4 }
 0x2d0   :  { %1393 = vmatpush3.bf16.xpose.msra.mxu0 %v932_v60  ;;  %vm519_vm4 = vcmp.lt.s32.totalorder %v517_v7, %v518_v12 }
 0x2d1   :  { %1394 = vmatprep.subr.bf16.mxu0 %v1451_v18  ;;  %v520_v20 = vsel %vm519_vm4, %v517_v7, %v518_v12 }
 0x2d2   :  { %1413 = vmatpush3.bf16.xpose.msra.mxu1 %v1061_v61  ;;  %v521_v47 = vrot.slane %v520_v20, 2 }
 0x2d3   :  { %1414 = vmatprep.subr.bf16.mxu1 %v1451_v18 }
 0x2d4   :  { %vm522_vm6 = vcmp.lt.s32.totalorder %v520_v20, %v521_v47 }
 0x2d5   :  { %v523_v44 = vsel %vm522_vm6, %v520_v20, %v521_v47 }
 0x2d6   :  { %v524_v50 = vrot.slane %v523_v44, 1 }
 0x2d8   :  { %1395 = vmatpush3.bf16.xpose.msra.mxu0 %v929_v31  ;;  %vm525_vm9 = vcmp.lt.s32.totalorder %v523_v44, %v524_v50 }
 0x2d9   :  { %1396 = vmatprep.subr.bf16.mxu0 %v1451_v18  ;;  %v526_v39 = vsel %vm525_vm9, %v523_v44, %v524_v50 }
 0x2da   :  { %1415 = vmatpush3.bf16.xpose.msra.mxu1 %v1058_v56 }
 0x2db   :  { %1416 = vmatprep.subr.bf16.mxu1 %v1451_v18  ;;  %v1450_v18 = vld [vmem:[%s2055_s8] sm:$0xff]  }
 0x2e0   :  { %1397 = vmatpush3.bf16.xpose.msra.mxu0 %v926_v0 }
 0x2e2   :  { %1417 = vmatpush3.bf16.xpose.msra.mxu1 %v1055_v24 }
 0x2e7   :  { %1399 = vmatmul.mubr.msk.bf16.vlgmr.msra.gmra.mxu0 %vm115_vm0, %v1210_v32 }
 0x2e9   :  { %1419 = vmatmul.mubr.msk.bf16.vlgmr.msra.gmra.mxu1 %vm115_vm0, %v1450_v18 }
 0x3a7   :  { %v983_v4 = vpop.f32.mrf.mxu0 }
 0x3a8   :  { %v991_v6 = vmul.f32 2.0, %v983_v4 }
 0x3a9   :  { %v1400_v8 = vpop.f32.mrf.mxu0  ;;  %v1112_v9 = vpop.f32.mrf.mxu1 }
 0x3aa   :  { %v997_v15 = vsub.f32 %v995_v5, %v991_v6  ;;  %1119 = vst [vmem:[%s2056_s11] sm:$0xff] %v1112_v9 }
 0x3ab   :  { %v986_v10 = vpop.f32.mrf.mxu0  ;;  %v1420_v11 = vpop.f32.mrf.mxu1 }
 0x3ac   :  { %v998_v45 = vsel %vm507_vm2, %v997_v15, inf }
 0x3ad   :  { %v999_v13 = vrot.slane %v998_v45, 4  ;;  %v1401_v49 = vpop.f32.mrf.mxu0  ;;  %v1115_v14 = vpop.f32.mrf.mxu1 }
 0x3ae   :  { %1120 = vst [vmem:[%s2056_s11 + $0x8] sm:$0xff] %v1115_v14 }
 0x3af   :  { %v1000_v19 = vmin.f32 %v998_v45, %v999_v13  ;;  %v1421_v16 = vpop.f32.mrf.mxu1 }
 0x3b1   :  { %v1001_v17 = vrot.slane %v1000_v19, 2 }
 0x3b3   :  { %v1002_v52 = vmin.f32 %v1000_v19, %v1001_v17 }
 0x3b5   :  { %v1003_v22 = vrot.slane %v1002_v52, 1 }
 0x3b7   :  { %v1004_v26 = vmin.f32 %v1002_v52, %v1003_v22 }
 0x3b9   :  { %vm1005_vm5 = vcmp.le.f32.partialorder %v997_v15, %v1004_v26 }
 0x3ba   :  { %v1006_v30 = vsel %vm1005_vm5, %v506_v2, 4 }
 0x3bb   :  { %v1007_v34 = vsel %vm507_vm2, %v1006_v30, 2147483647 }
 0x3bc   :  { %v1008_v41 = vrot.slane %v1007_v34, 4 }
 0x3be   :  { %vm1009_vm7 = vcmp.lt.s32.totalorder %v1007_v34, %v1008_v41 }
 0x3bf   :  { %v1010_v37 = vsel %vm1009_vm7, %v1007_v34, %v1008_v41 }
 0x3c0   :  { %v1011_v53 = vrot.slane %v1010_v37, 2 }
 0x3c2   :  { %vm1012_vm8 = vcmp.lt.s32.totalorder %v1010_v37, %v1011_v53 }
 0x3c3   :  { %v1013_v55 = vsel %vm1012_vm8, %v1010_v37, %v1011_v53 }
 0x3c4   :  { %v1014_v43 = vrot.slane %v1013_v55, 1 }
 0x3c6   :  { %vm1015_vm11 = vcmp.lt.s32.totalorder %v1013_v55, %v1014_v43 }
 0x3c7   :  { %v1016_v57 = vsel %vm1015_vm11, %v1013_v55, %v1014_v43 }
 0x3c8   :  { %v1018_v58 = vsel %vm1017_vm10, %v526_v39, %v1016_v57 }
 0x3c9   :  { %1019 = vst [vmem:[%s2057_s10] sm:$0x3] %v1018_v58 }

</bundles_post_ra>
